<compile_context>
chip_gen: v7x
topology: tpu7x:2x2x1
jax: 0.10.0
libtpu: 0.0.40
codegen_flags: <defaults>
</compile_context>

<pallas_src>
import functools

import jax
import jax.numpy as jnp
from jax.experimental import pallas as pl
from jax.experimental.pallas import tpu as pltpu

LANE = 128          # hidden dim padded to the 128-lane vreg width
MAX_TB = 1024       # max batch rows per grid step


def _round_up(n, m):
    return ((n + m - 1) // m) * m


def dqn_kernel(alpha_ref,   # SMEM (3,)            PReLU slopes (scalar prefetch)
               x_ref,       # VMEM [TB, S]         states, S = state_dim (unpadded)
               w0_ref,      # VMEM [S, LANE]       first-layer weight (out dim padded)
               wh_ref,      # VMEM [3, LANE, LANE] padded w1 | w2 | w3
               bh_ref,      # VMEM [4, LANE]       padded b0 | b1 | b2 | b3
               q_ref):      # VMEM [TB, A]         Q-values, A = action_size (unpadded)
    # Hoist scalar slope loads off the matmul critical path.
    a0 = alpha_ref[0]
    a1 = alpha_ref[1]
    a2 = alpha_ref[2]

    x = x_ref[...]                               # [TB, S]
    w0 = w0_ref[...]                             # [S, LANE]

    # Layer 0 on the VPU: contraction dim S (e.g. 4) is tiny, so an unrolled
    # broadcast-FMA chain is cheaper and safer than an MXU matmul with K=S.
    h = bh_ref[0:1, :] + x[:, 0:1] * w0[0:1, :]
    for k in range(1, x.shape[1]):
        h = h + x[:, k:k + 1] * w0[k:k + 1, :]
    h = jnp.where(h >= 0, h, a0 * h)             # PReLU (single shared slope)

    h = jnp.dot(h, wh_ref[0], preferred_element_type=jnp.float32) + bh_ref[1:2, :]
    h = jnp.where(h >= 0, h, a1 * h)

    h = jnp.dot(h, wh_ref[1], preferred_element_type=jnp.float32) + bh_ref[2:3, :]
    h = jnp.where(h >= 0, h, a2 * h)

    q = jnp.dot(h, wh_ref[2], preferred_element_type=jnp.float32) + bh_ref[3:4, :]
    # Slice to the real action width *before* the store: only A lanes reach HBM.
    q_ref[...] = q[:, : q_ref.shape[1]].astype(q_ref.dtype)


def _pad2d(a, rows, cols):
    out = jnp.zeros((rows, cols), a.dtype)
    return out.at[: a.shape[0], : a.shape[1]].set(a)


def pad_params(p, lane=LANE):
    """Pack params for the kernel: keep w0's narrow input dim, zero-pad all
    hidden-side dims to `lane`, and concatenate hidden weights/biases so the
    kernel sees 3 resident tensor refs instead of 8."""
    state_dim = p["w0"].shape[0]
    return dict(
        alpha=p["alpha"].astype(jnp.float32),
        w0=_pad2d(p["w0"], state_dim, lane),
        wh=jnp.stack([_pad2d(p["w1"], lane, lane),
                      _pad2d(p["w2"], lane, lane),
                      _pad2d(p["w3"], lane, lane)]),
        bh=jnp.concatenate([_pad2d(p["b0"], 1, lane),
                            _pad2d(p["b1"], 1, lane),
                            _pad2d(p["b2"], 1, lane),
                            _pad2d(p["b3"], 1, lane)], axis=0),
    )


@functools.partial(jax.jit, static_argnames=("action_size",))
def dqn_forward(x, pp, *, action_size):
    """x: [B, state_dim] f32; pp: packed params from pad_params(). Returns [B, action_size]."""
    B, state_dim = x.shape
    lane = pp["wh"].shape[-1]
    x = x.astype(jnp.float32)

    # Batch tile: as big as possible (per-grid-step overhead dominates small
    # tiles), but keep >= 2 steps when the batch allows so the "parallel"
    # batch axis can shard across both TensorCores on v7x.
    if B <= 64:
        tb = _round_up(B, 8)
    else:
        tb = min(MAX_TB, _round_up((B + 1) // 2, 8))
    b_pad = _round_up(B, tb)

    x_p = x if b_pad == B else jnp.zeros((b_pad, state_dim), jnp.float32).at[:B].set(x)

    resident2 = lambda i, alpha: (0, 0)       # same block every step -> VMEM-resident
    resident3 = lambda i, alpha: (0, 0, 0)
    batched = lambda i, alpha: (i, 0)         # x / q tile over the batch axis

    q = pl.pallas_call(
        dqn_kernel,
        out_shape=jax.ShapeDtypeStruct((b_pad, action_size), jnp.float32),
        grid_spec=pltpu.PrefetchScalarGridSpec(
            num_scalar_prefetch=1,            # alpha -> SMEM
            grid=(b_pad // tb,),
            in_specs=[
                pl.BlockSpec((tb, state_dim), batched),      # x (narrow, unpadded lanes)
                pl.BlockSpec((state_dim, lane), resident2),  # w0
                pl.BlockSpec((3, lane, lane), resident3),    # w1 | w2 | w3
                pl.BlockSpec((4, lane), resident2),          # b0 | b1 | b2 | b3
            ],
            out_specs=pl.BlockSpec((tb, action_size), batched),
        ),
        compiler_params=pltpu.CompilerParams(
            dimension_semantics=("parallel",),  # shard batch tiles across TCs on v7x
        ),
    )(pp["alpha"], x_p, pp["w0"], pp["wh"], pp["bh"])

    return q if b_pad == B else q[:B]


def init_params(key, state_dim, action_size, hidden_size=16):
    """Mimics PyTorch nn.Linear default init (uniform +/- 1/sqrt(fan_in)); w stored [in, out]."""
    def linear(key, fan_in, fan_out):
        kw, kb = jax.random.split(key)
        bound = 1.0 / jnp.sqrt(jnp.float32(fan_in))
        w = jax.random.uniform(kw, (fan_in, fan_out), jnp.float32, -bound, bound)
        b = jax.random.uniform(kb, (1, fan_out), jnp.float32, -bound, bound)
        return w, b

    k0, k1, k2, k3 = jax.random.split(key, 4)
    w0, b0 = linear(k0, state_dim, hidden_size)
    w1, b1 = linear(k1, hidden_size, hidden_size)
    w2, b2 = linear(k2, hidden_size, hidden_size)
    w3, b3 = linear(k3, hidden_size, action_size)
    alpha = jnp.full((3,), 0.25, jnp.float32)   # nn.PReLU() default init
    return dict(w0=w0, b0=b0, w1=w1, b1=b1, w2=w2, b2=b2, w3=w3, b3=b3, alpha=alpha)


def dqn_reference(x, p):
    def prelu(h, a):
        return jnp.where(h >= 0, h, a * h)
    h = prelu(x @ p["w0"] + p["b0"], p["alpha"][0])
    h = prelu(h @ p["w1"] + p["b1"], p["alpha"][1])
    h = prelu(h @ p["w2"] + p["b2"], p["alpha"][2])
    return h @ p["w3"] + p["b3"]


if __name__ == "__main__":
    key = jax.random.PRNGKey(0)
    kx, kp = jax.random.split(key)

    # Small DQN shapes (CartPole-like): state_dim=4, action_size=2, hidden=16.
    # Batch of 256 exercises the batch grid (2 tiles of 128 -> both v7x TCs).
    batch, state_dim, action_size = 256, 4, 2
    x = jax.random.normal(kx, (batch, state_dim), jnp.float32)

    params = init_params(kp, state_dim, action_size)
    packed = pad_params(params)

    q = dqn_forward(x, packed, action_size=action_size)
    jax.block_until_ready(q)

    q_ref = dqn_reference(x, params)
    assert q.shape == (batch, action_size)
    assert jnp.allclose(q, q_ref, atol=1e-4, rtol=1e-4), float(jnp.max(jnp.abs(q - q_ref)))

    print("KERNEL_OK")
</pallas_src>

<mosaic_0001>
module attributes {stable_mosaic.version = 11 : i64} {
  func.func @dqn_kernel(%arg0: i32, %arg1: memref<3xf32, #tpu.memory_space<smem>>, %arg2: memref<128x4xf32, #tpu.memory_space<vmem>>, %arg3: memref<4x128xf32, #tpu.memory_space<vmem>>, %arg4: memref<3x128x128xf32, #tpu.memory_space<vmem>>, %arg5: memref<4x128xf32, #tpu.memory_space<vmem>>, %arg6: memref<128x2xf32, #tpu.memory_space<vmem>>) attributes {dimension_semantics = [#tpu.dimension_semantics<parallel>], iteration_bounds = array<i64: 2>, scalar_prefetch = 1 : i64, scratch_operands = 0 : i64, tpu.core_type = #tpu.core_type<tc>, window_params = [{transform_indices = @transform_0, window_bounds = array<i64: 128, 4>}, {pipeline_mode = #tpu.pipeline_mode<synchronous>, transform_indices = @transform_1, window_bounds = array<i64: 4, 128>}, {pipeline_mode = #tpu.pipeline_mode<synchronous>, transform_indices = @transform_2, window_bounds = array<i64: 3, 128, 128>}, {pipeline_mode = #tpu.pipeline_mode<synchronous>, transform_indices = @transform_3, window_bounds = array<i64: 4, 128>}, {transform_indices = @transform_4, window_bounds = array<i64: 128, 2>}]} {
    %c0 = arith.constant 0 : index
    %0 = memref.load %arg1[%c0] : memref<3xf32, #tpu.memory_space<smem>>
    %c1 = arith.constant 1 : index
    %1 = memref.load %arg1[%c1] : memref<3xf32, #tpu.memory_space<smem>>
    %c2 = arith.constant 2 : index
    %2 = memref.load %arg1[%c2] : memref<3xf32, #tpu.memory_space<smem>>
    %c0_0 = arith.constant 0 : index
    %c0_1 = arith.constant 0 : index
    %3 = vector.load %arg2[%c0_0, %c0_1] : memref<128x4xf32, #tpu.memory_space<vmem>>, vector<128x4xf32>
    %c0_2 = arith.constant 0 : index
    %c0_3 = arith.constant 0 : index
    %4 = vector.load %arg3[%c0_2, %c0_3] : memref<4x128xf32, #tpu.memory_space<vmem>>, vector<4x128xf32>
    %c0_4 = arith.constant 0 : index
    %c0_5 = arith.constant 0 : index
    %5 = vector.load %arg5[%c0_4, %c0_5] : memref<4x128xf32, #tpu.memory_space<vmem>>, vector<1x128xf32>
    %6 = vector.extract_strided_slice %3 {offsets = [0, 0], sizes = [128, 1], strides = [1, 1]} : vector<128x4xf32> to vector<128x1xf32>
    %7 = vector.extract_strided_slice %4 {offsets = [0, 0], sizes = [1, 128], strides = [1, 1]} : vector<4x128xf32> to vector<1x128xf32>
    %8 = vector.broadcast %6 : vector<128x1xf32> to vector<128x128xf32>
    %9 = vector.broadcast %7 : vector<1x128xf32> to vector<128x128xf32>
    %10 = arith.mulf %8, %9 : vector<128x128xf32>
    %11 = vector.broadcast %5 : vector<1x128xf32> to vector<128x128xf32>
    %12 = arith.addf %11, %10 : vector<128x128xf32>
    %13 = vector.extract_strided_slice %3 {offsets = [0, 1], sizes = [128, 1], strides = [1, 1]} : vector<128x4xf32> to vector<128x1xf32>
    %14 = vector.extract_strided_slice %4 {offsets = [1, 0], sizes = [1, 128], strides = [1, 1]} : vector<4x128xf32> to vector<1x128xf32>
    %15 = vector.broadcast %13 : vector<128x1xf32> to vector<128x128xf32>
    %16 = vector.broadcast %14 : vector<1x128xf32> to vector<128x128xf32>
    %17 = arith.mulf %15, %16 : vector<128x128xf32>
    %18 = arith.addf %12, %17 : vector<128x128xf32>
    %19 = vector.extract_strided_slice %3 {offsets = [0, 2], sizes = [128, 1], strides = [1, 1]} : vector<128x4xf32> to vector<128x1xf32>
    %20 = vector.extract_strided_slice %4 {offsets = [2, 0], sizes = [1, 128], strides = [1, 1]} : vector<4x128xf32> to vector<1x128xf32>
    %21 = vector.broadcast %19 : vector<128x1xf32> to vector<128x128xf32>
    %22 = vector.broadcast %20 : vector<1x128xf32> to vector<128x128xf32>
    %23 = arith.mulf %21, %22 : vector<128x128xf32>
    %24 = arith.addf %18, %23 : vector<128x128xf32>
    %25 = vector.extract_strided_slice %3 {offsets = [0, 3], sizes = [128, 1], strides = [1, 1]} : vector<128x4xf32> to vector<128x1xf32>
    %26 = vector.extract_strided_slice %4 {offsets = [3, 0], sizes = [1, 128], strides = [1, 1]} : vector<4x128xf32> to vector<1x128xf32>
    %27 = vector.broadcast %25 : vector<128x1xf32> to vector<128x128xf32>
    %28 = vector.broadcast %26 : vector<1x128xf32> to vector<128x128xf32>
    %29 = arith.mulf %27, %28 : vector<128x128xf32>
    %30 = arith.addf %24, %29 : vector<128x128xf32>
    %cst = arith.constant 0.000000e+00 : f32
    %31 = vector.broadcast %cst : f32 to vector<128x128xf32>
    %32 = arith.cmpf oge, %30, %31 : vector<128x128xf32>
    %33 = vector.broadcast %0 : f32 to vector<128x128xf32>
    %34 = arith.mulf %33, %30 : vector<128x128xf32>
    %35 = arith.select %32, %30, %34 : vector<128x128xi1>, vector<128x128xf32>
    %c0_6 = arith.constant 0 : index
    %c0_7 = arith.constant 0 : index
    %c0_8 = arith.constant 0 : index
    %36 = vector.load %arg4[%c0_6, %c0_7, %c0_8] : memref<3x128x128xf32, #tpu.memory_space<vmem>>, vector<1x128x128xf32>
    %37 = vector.shape_cast %36 : vector<1x128x128xf32> to vector<128x128xf32>
    %cst_9 = arith.constant dense<0.000000e+00> : vector<128x128xf32>
    %38 = tpu.matmul %35, %37, %cst_9 {dimension_numbers = #tpu.dot_dimension_numbers<[1], [0], [0], [1], [0, 0, 1, 1], [], []>} : vector<128x128xf32>, vector<128x128xf32>, vector<128x128xf32> -> vector<128x128xf32>
    %c1_10 = arith.constant 1 : index
    %c0_11 = arith.constant 0 : index
    %39 = vector.load %arg5[%c1_10, %c0_11] : memref<4x128xf32, #tpu.memory_space<vmem>>, vector<1x128xf32>
    %40 = vector.broadcast %39 : vector<1x128xf32> to vector<128x128xf32>
    %41 = arith.addf %38, %40 : vector<128x128xf32>
    %cst_12 = arith.constant 0.000000e+00 : f32
    %42 = vector.broadcast %cst_12 : f32 to vector<128x128xf32>
    %43 = arith.cmpf oge, %41, %42 : vector<128x128xf32>
    %44 = vector.broadcast %1 : f32 to vector<128x128xf32>
    %45 = arith.mulf %44, %41 : vector<128x128xf32>
    %46 = arith.select %43, %41, %45 : vector<128x128xi1>, vector<128x128xf32>
    %c1_13 = arith.constant 1 : index
    %c0_14 = arith.constant 0 : index
    %c0_15 = arith.constant 0 : index
    %47 = vector.load %arg4[%c1_13, %c0_14, %c0_15] : memref<3x128x128xf32, #tpu.memory_space<vmem>>, vector<1x128x128xf32>
    %48 = vector.shape_cast %47 : vector<1x128x128xf32> to vector<128x128xf32>
    %cst_16 = arith.constant dense<0.000000e+00> : vector<128x128xf32>
    %49 = tpu.matmul %46, %48, %cst_16 {dimension_numbers = #tpu.dot_dimension_numbers<[1], [0], [0], [1], [0, 0, 1, 1], [], []>} : vector<128x128xf32>, vector<128x128xf32>, vector<128x128xf32> -> vector<128x128xf32>
    %c2_17 = arith.constant 2 : index
    %c0_18 = arith.constant 0 : index
    %50 = vector.load %arg5[%c2_17, %c0_18] : memref<4x128xf32, #tpu.memory_space<vmem>>, vector<1x128xf32>
    %51 = vector.broadcast %50 : vector<1x128xf32> to vector<128x128xf32>
    %52 = arith.addf %49, %51 : vector<128x128xf32>
    %cst_19 = arith.constant 0.000000e+00 : f32
    %53 = vector.broadcast %cst_19 : f32 to vector<128x128xf32>
    %54 = arith.cmpf oge, %52, %53 : vector<128x128xf32>
    %55 = vector.broadcast %2 : f32 to vector<128x128xf32>
    %56 = arith.mulf %55, %52 : vector<128x128xf32>
    %57 = arith.select %54, %52, %56 : vector<128x128xi1>, vector<128x128xf32>
    %c2_20 = arith.constant 2 : index
    %c0_21 = arith.constant 0 : index
    %c0_22 = arith.constant 0 : index
    %58 = vector.load %arg4[%c2_20, %c0_21, %c0_22] : memref<3x128x128xf32, #tpu.memory_space<vmem>>, vector<1x128x128xf32>
    %59 = vector.shape_cast %58 : vector<1x128x128xf32> to vector<128x128xf32>
    %cst_23 = arith.constant dense<0.000000e+00> : vector<128x128xf32>
    %60 = tpu.matmul %57, %59, %cst_23 {dimension_numbers = #tpu.dot_dimension_numbers<[1], [0], [0], [1], [0, 0, 1, 1], [], []>} : vector<128x128xf32>, vector<128x128xf32>, vector<128x128xf32> -> vector<128x128xf32>
    %c3 = arith.constant 3 : index
    %c0_24 = arith.constant 0 : index
    %61 = vector.load %arg5[%c3, %c0_24] : memref<4x128xf32, #tpu.memory_space<vmem>>, vector<1x128xf32>
    %62 = vector.broadcast %61 : vector<1x128xf32> to vector<128x128xf32>
    %63 = arith.addf %60, %62 : vector<128x128xf32>
    %64 = vector.extract_strided_slice %63 {offsets = [0, 0], sizes = [128, 2], strides = [1, 1]} : vector<128x128xf32> to vector<128x2xf32>
    %c0_25 = arith.constant 0 : index
    %c0_26 = arith.constant 0 : index
    %65 = vector.load %arg6[%c0_25, %c0_26] : memref<128x2xf32, #tpu.memory_space<vmem>>, vector<128x2xf32>
    tpu.vector_store %arg6[%c0_25, %c0_26], %64 {strides = array<i32>} : memref<128x2xf32, #tpu.memory_space<vmem>>, vector<128x2xf32>,
    return
  }
  func.func @transform_0(%arg0: i32, %arg1: memref<3xf32, #tpu.memory_space<smem>>) -> (i32, i32) {
    %c0_i32 = arith.constant 0 : i32
    %c0_i32_0 = arith.constant 0 : i32
    return %arg0, %c0_i32 : i32, i32
  }
  func.func @transform_1(%arg0: i32, %arg1: memref<3xf32, #tpu.memory_space<smem>>) -> (i32, i32) {
    %c0_i32 = arith.constant 0 : i32
    %c0_i32_0 = arith.constant 0 : i32
    %c0_i32_1 = arith.constant 0 : i32
    return %c0_i32, %c0_i32_0 : i32, i32
  }
  func.func @transform_2(%arg0: i32, %arg1: memref<3xf32, #tpu.memory_space<smem>>) -> (i32, i32, i32) {
    %c0_i32 = arith.constant 0 : i32
    %c0_i32_0 = arith.constant 0 : i32
    %c0_i32_1 = arith.constant 0 : i32
    %c0_i32_2 = arith.constant 0 : i32
    return %c0_i32, %c0_i32_0, %c0_i32_1 : i32, i32, i32
  }
  func.func @transform_3(%arg0: i32, %arg1: memref<3xf32, #tpu.memory_space<smem>>) -> (i32, i32) {
    %c0_i32 = arith.constant 0 : i32
    %c0_i32_0 = arith.constant 0 : i32
    %c0_i32_1 = arith.constant 0 : i32
    return %c0_i32, %c0_i32_0 : i32, i32
  }
  func.func @transform_4(%arg0: i32, %arg1: memref<3xf32, #tpu.memory_space<smem>>) -> (i32, i32) {
    %c0_i32 = arith.constant 0 : i32
    %c0_i32_0 = arith.constant 0 : i32
    return %arg0, %c0_i32 : i32, i32
  }
}

</mosaic_0001>

<bundles_post_ra>
// kernel: dqn_forward.1
= control target key start
LH: loop header
LB: loop body
LE: loop exit
PB: predicated region body
PF: predicated region fallthrough
CT: control target
= control target key end

     0   :  { %s2370_s0 = inlined_call_operand.vmem [shape: f32[3], index: 0, kind: input, shape index: {}]   ;;  %s2371_s1 = inlined_call_operand.vmem [shape: f32[256,4], index: 1, kind: input, shape index: {}]   ;;  %s2372_s2 = inlined_call_operand.vmem [shape: f32[4,128], index: 2, kind: input, shape index: {}]   ;;  %s2373_s3 = inlined_call_operand.hbm [shape: f32[3,128,128], index: 3, kind: input, shape index: {}]   ;;  %s2374_s4 = inlined_call_operand.vmem [shape: f32[4,128], index: 4, kind: input, shape index: {}]   ;;  %s2375_s5 = inlined_call_operand.vmem [shape: f32[256,2], index: 5, kind: output, shape index: {}]  }
   0x1   :  { %s10_s20 = sshll.u32 %s2370_s0, 4  ;;  %s11_s20 = int_to_ptr.vmem [resolvable:$true] %s10_s20 }
   0x2   :  { %s1852_s21 = scalar_lea.vmem %s11_s20, 16  ;;  %p1857_p1 = scmp.lt.s32.totalorder %s11_s20, %s11_s20 }
   0x3   :  { %p1853_p0 = scmp.ne.s32.totalorder %s11_s20, %s1852_s21  ;;  %p1858_p2 = scmp.lt.s32.totalorder %s1852_s21, %s1852_s21 }
   0x5   :  { %p1859_p3 = por %p1858_p2, %p1857_p1 }
   0x7   :  { %p1860_p4 = pnand %p1859_p3, %p1853_p0 }
   0x9   :  { %1863 = shalt.err (!%p1860_p4)  }
   0xa   :  { %s1906_s22 = smov [#allocation3]  }
   0xb   :  { %13 = dma.vmem_to_smem %s11_s20, 16, %s1906_s22, [#allocation2] }
   0xc   :  { %1896 = dma.done.wait [#allocation2], 16 }
   0xd   :  { %1897 = vsyncadd [#allocation2], 4294967280 }
   0xe   :  { %15 = sfence }
   0xf   :  { %16 = vsyncpa [#allocation5], 0  ;;  %s1947_s23 = smov 0  }
  0x10 LB: > { %s1396_s0 = sadd.s32 4294967295, %s1904_s23   ;;  %p1398_p5 = scmp.ge.s32.totalorder %s1904_s23, 1  ;;  %s1904_s23 = sphi %s1947_s23, %s22_s23  }
  0x11   : > { %p142_p6 = scmp.lt.s32.totalorder %s1904_s23, 3  ;;  %s1907_s24 = smov [#allocation4]  }
  0x12   : > { %s157_s25 = sshll.u32 %s1907_s24, 4  ;;  %p1961_p8 = scmp.eq.s32.totalorder %s1396_s0, 0  ;;  %s158_s25 = int_to_ptr.vmem [resolvable:$true] %s157_s25 }
  0x13   : > { %p1955_p7 = pnand %p1398_p5, %p142_p6  ;;  %s1864_s6 = scalar_lea.hbm %s2373_s3, 6144 }
  0x14   : > { %s2380_s27 = scalar_select %p1961_p8, 1, 0 }
  0x15   : > { %s2379_s26 = scalar_select %p1955_p7, 1, 0 }
  0x16   : > { %p1795_p9 = pneg %p1955_p7  ;;  %p1865_p11 = scmp.ne.s32.totalorder %s2373_s3, %s1864_s6 }
  0x17   : > { %p1871_p1 = scmp.lt.u32.totalorder %s1864_s6, %s2373_s3 }
  0x18   : > { %p1969_p10 = pnand %p1961_p8, %p1795_p9 }
  0x1a   : > { %p1866_p12 = pneg %p1969_p10 }
  0x1c   : > { %p1867_p13 = pnand %p1866_p12, %p1865_p11 }
  0x1e   : > { %p1868_p0 = pneg %p1867_p13 }
  0x20   : > { %p1873_p2 = pnand %p1871_p1, %p1868_p0 }
  0x22   : > { %1876 = shalt.err (!%p1873_p2)
}
  0x23   : > { %s1877_s11 = scalar_lea.vmem %s158_s25, 6144  ;;  %p1885_p6 = scmp.lt.s32.totalorder %s158_s25, %s158_s25 }
  0x24   : > { %p1878_p3 = scmp.ne.s32.totalorder %s158_s25, %s1877_s11  ;;  %p1886_p9 = scmp.lt.s32.totalorder %s1877_s11, %s1877_s11 }
  0x26   : > { %p1880_p4 = pnand %p1878_p3, %p1866_p12  ;;  %p1887_p8 = por %p1886_p9, %p1885_p6 }
  0x28   : > { %p1881_p5 = pneg %p1880_p4 }
  0x2a   : > { %p1888_p7 = pnand %p1887_p8, %p1881_p5 }
  0x2c   : > { %1891 = shalt.err (!%p1888_p7)
}
  0x2d   : > { %s1908_s12 = smov 128   ;;  %s1909_s13 = smov 8  }
  0x2e   : > { %1798 = dma.hbm_to_vmem [thread:$0]  (!%p1969_p10), %s2373_s3, 6144, %s158_s25, [#allocation5], %s1908_s12, %s1908_s12, %s1909_s13  }
  0x2f   : > { %p2382_p11 = scmp.ne.s32.totalorder %s2379_s26, 0 }
  0x30   : > { %p2383_p13 = scmp.ne.s32.totalorder (!%p2382_p11), %s2380_s27, 0 }
  0x31   : > { %185 = sbr.rel (%p2382_p11) target bundleno = 1042 (0x412), region = 36 }
  0x38   : > { %1899 = dma.done.wait (%p2383_p13), [#allocation5], 6144  }
  0x39   : > { %1901 = vsyncadd (%p2383_p13), [#allocation5], 4294961152  ;;  %s1403_s16 = sshll.u32 %s1396_s0, 4  ;;  %v1910_v0 = vmov 3   ;;  %v1911_v1 = vmov 1   ;;  %v713_v5 = vld [vmem:[#allocation4] sm:$0xff]  ;;  %v324_v45 = vlaneseq }
  0x3a   : > { %1821 = vset.pattern.permute.xlu0 %v1910_v0  ;;  %1817 = vset.pattern.permute.xlu1 %v1911_v1  ;;  %p212_p7 = scmp.lt.s32.totalorder %s1403_s16, 31  ;;  %v714_v6 = vld [vmem:[#allocation4 + $0x8] sm:$0xff]  ;;  %v715_v7 = vld [vmem:[#allocation4 + $0x10] sm:$0xff]  ;;  %v716_v8 = vld [vmem:[#allocation4 + $0x18] sm:$0xff]  ;;  %v1912_v14 = vmov 2   ;;  %v1913_v20 = vmov 0  }
  0x3b   : > { %v1679_v10 = vpack.c.bf16 %v714_v6, %v713_v5  ;;  %v1683_v11 = vpack.c.bf16 %v716_v8, %v715_v7  ;;  %v717_v12 = vld [vmem:[#allocation4 + $0x20] sm:$0xff]  ;;  %v718_v13 = vld [vmem:[#allocation4 + $0x28] sm:$0xff]  ;;  %v719_v17 = vld [vmem:[#allocation4 + $0x30] sm:$0xff]  ;;  %v325_v48 = vshrl.u32 %v324_v45, 7  ;;  %s223_s25 = sld [smem:[#allocation3]]  ;;  %s1407_s26 = sld [smem:[#allocation3 + $0x1]] }
  0x3c   : > { %s2385_s16 = smov (!%p212_p7, %s1403_s16), 31  ;;  %v1687_v16 = vpack.c.bf16 %v718_v13, %v717_v12  ;;  %v720_v18 = vld [vmem:[#allocation4 + $0x38] sm:$0xff]  ;;  %v721_v21 = vld [vmem:[#allocation4 + $0x40] sm:$0xff]  ;;  %v722_v22 = vld [vmem:[#allocation4 + $0x48] sm:$0xff]  ;;  %s1408_s29 = sld [smem:[#allocation3 + $0x2]] }
  0x3d   : > { %s1404_s17 = sshll.u32 %s2385_s16, 3  ;;  %1680 = vmatprep.subr.bf16.mxu0 %v1679_v10  ;;  %v1691_v19 = vpack.c.bf16 %v720_v18, %v719_v17  ;;  %v1695_v23 = vpack.c.bf16 %v722_v22, %v721_v21  ;;  %v723_v25 = vld [vmem:[#allocation4 + $0x50] sm:$0xff]  ;;  %v724_v26 = vld [vmem:[#allocation4 + $0x58] sm:$0xff]  ;;  %v725_v28 = vld [vmem:[#allocation4 + $0x60] sm:$0xff]  ;;  %v326_v51 = vsub.s32 0, %v325_v48  ;;  %v430_v52 = vsub.s32 1, %v325_v48 }
  0x3e   : > { %s2007_s20 = scalar_lea.vmem %s2371_s1, %s1404_s17  ;;  %1682 = vmatpush3.bf16.msra.mxu0 %v1679_v10  ;;  %v1699_v27 = vpack.c.bf16 %v724_v26, %v723_v25  ;;  %v726_v29 = vld [vmem:[#allocation4 + $0x68] sm:$0xff]  ;;  %v727_v32 = vld [vmem:[#allocation4 + $0x70] sm:$0xff]  ;;  %v728_v33 = vld [vmem:[#allocation4 + $0x78] sm:$0xff]  ;;  %v530_v56 = vsub.s32 2, %v325_v48  ;;  %v630_v59 = vsub.s32 3, %v325_v48  ;;  %s2333_s11 = scalar_lea.vmem %s2375_s5, %s1404_s17 }
  0x3f   : > { %v227_v2 = vld [vmem:[%s2007_s20 + $0x8] sm:$0xff]  ;;  %v226_v3 = vld [vmem:[%s2007_s20] sm:$0xff]  ;;  %v2012_v4 = vld [vmem:[%s2007_s20 + $0x10] sm:$0xff]  ;;  %1684 = vmatprep.subr.bf16.mxu0 %v1683_v11  ;;  %v1703_v31 = vpack.c.bf16 %v726_v29, %v725_v28  ;;  %v1707_v35 = vpack.c.bf16 %v728_v33, %v727_v32 }
  0x40   : > { %569 = vperm.xlu0 %1821, %v227_v2   ;;  %365 = vperm.xlu1 %1817, %v226_v3   ;;  %v2016_v9 = vld [vmem:[%s2007_s20 + $0x38] sm:$0xff]  ;;  %v2021_v15 = vld [vmem:[%s2007_s20 + $0x40] sm:$0xff]  ;;  %v231_v34 = vld [vmem:[%s2007_s20 + $0x28] sm:$0xff] }
  0x41   : > { %v229_v24 = vld [vmem:[%s2007_s20 + $0x18] sm:$0xff]  ;;  %v230_v30 = vld [vmem:[%s2007_s20 + $0x20] sm:$0xff]  ;;  %v232_v36 = vld [vmem:[%s2007_s20 + $0x30] sm:$0xff]  ;;  %v2119_v17 = vstv %s223_s25 }
  0x42   : > { %1686 = vmatpush3.bf16.msra.mxu0 %v1683_v11  ;;  %v2036_v37 = vld [vmem:[%s2007_s20 + $0x58] sm:$0xff]  ;;  %v2041_v38 = vld [vmem:[%s2007_s20 + $0x60] sm:$0xff]  ;;  %v2058_v39 = vld [vmem:[%s2007_s20 + $0x68] sm:$0xff] }
  0x43   : > { %1688 = vmatprep.subr.bf16.mxu0 %v1687_v16  ;;  %v235_v40 = vld [vmem:[%s2007_s20 + $0x48] sm:$0xff]  ;;  %v2065_v41 = vld [vmem:[%s2007_s20 + $0x70] sm:$0xff]  ;;  %v242_v54 = vld [vmem:[%s2372_s2] sm:$0xf] }
  0x44   : > { %573 = vperm.xlu0 %1821, %v2012_v4   ;;  %369 = vperm.xlu1 %1817, %v227_v2   ;;  %v236_v42 = vld [vmem:[%s2007_s20 + $0x50] sm:$0xff]  ;;  %v2095_v57 = vrot.slane %v242_v54, %v326_v51  ;;  %v2098_v58 = vrot.slane %v242_v54, %v430_v52  ;;  %v2103_v60 = vld [vmem:[%s2374_s4] ss:$0 sm:$0xff]  ;;  %v2105_v62 = vrot.slane %v242_v54, %v530_v56  ;;  %v241_v28 = vld [vmem:[%s2007_s20 + $0x78] sm:$0xff] }
  0x46   : > { %1690 = vmatpush3.bf16.msra.mxu0 %v1687_v16 }
  0x47   : > { %1692 = vmatprep.subr.bf16.mxu0 %v1691_v19 }
  0x48   : > { %593 = vperm.xlu0 %1821, %v2016_v9   ;;  %1818 = vset.pattern.permute.xlu1 %v1912_v14 }
  0x49   : > { %465 = vperm.xlu1 %1818, %v226_v3  }
  0x4a   : > { %1694 = vmatpush3.bf16.msra.mxu0 %v1691_v19 }
  0x4b   : > { %1696 = vmatprep.subr.bf16.mxu0 %v1695_v23 }
  0x4c   : > { %597 = vperm.xlu0 %1821, %v2021_v15  }
  0x4d   : > { %469 = vperm.xlu1 %1818, %v227_v2  }
  0x4e   : > { %1698 = vmatpush3.bf16.msra.mxu0 %v1695_v23 }
  0x4f   : > { %1700 = vmatprep.subr.bf16.mxu0 %v1699_v27 }
  0x50   : > { %1837 = vset.pattern.permute.xlu0 %v1913_v20 }
  0x51   : > { %246 = vperm.xlu0 %1837, %v226_v3   ;;  %1819 = vset.pattern.permute.xlu1 %v1910_v0 }
  0x52   : > { %565 = vperm.xlu1 %1819, %v226_v3   ;;  %1702 = vmatpush3.bf16.msra.mxu0 %v1699_v27 }
  0x53   : > { %1704 = vmatprep.subr.bf16.mxu0 %v1703_v31 }
  0x55   : > { %251 = vperm.xlu0 %1837, %v227_v2  }
  0x56   : > { %1820 = vset.pattern.permute.xlu1 %v1911_v1  ;;  %1706 = vmatpush3.bf16.msra.mxu0 %v1703_v31 }
  0x57   : > { %377 = vperm.xlu1 %1820, %v229_v24   ;;  %1708 = vmatprep.subr.bf16.mxu0 %v1707_v35 }
  0x59   : > { %256 = vperm.xlu0 %1837, %v2012_v4  }
  0x5a   : > { %1710 = vmatpush3.bf16.msra.mxu0 %v1707_v35 }
  0x5b   : > { %1822 = vset.pattern.permute.xlu1 %v1913_v20 }
  0x5c   : > { %266 = vperm.xlu1 %1822, %v230_v30  }
  0x5d   : > { %261 = vperm.xlu0 %1837, %v229_v24  }
  0x60   : > { %1823 = vset.pattern.permute.xlu1 %v1912_v14 }
  0x61   : > { %271 = vperm.xlu0 %1837, %v231_v34   ;;  %473 = vperm.xlu1 %1823, %v2012_v4  }
  0x65   : > { %276 = vperm.xlu0 %1837, %v232_v36   ;;  %477 = vperm.xlu1 %1823, %v229_v24  }
  0x69   : > { %301 = vperm.xlu0 %1837, %v2036_v37   ;;  %1824 = vset.pattern.permute.xlu1 %v1911_v1 }
  0x6a   : > { %381 = vperm.xlu1 %1824, %v230_v30  }
  0x6d   : > { %306 = vperm.xlu0 %1837, %v2041_v38  }
  0x6e   : > { %385 = vperm.xlu1 %1824, %v231_v34  }
  0x71   : > { %1839 = vset.pattern.permute.xlu0 %v1912_v14 }
  0x72   : > { %485 = vperm.xlu0 %1839, %v231_v34   ;;  %1825 = vset.pattern.permute.xlu1 %v1910_v0 }
  0x73   : > { %577 = vperm.xlu1 %1825, %v229_v24  }
  0x76   : > { %489 = vperm.xlu0 %1839, %v232_v36  }
  0x77   : > { %1826 = vset.pattern.permute.xlu1 %v1912_v14 }
  0x78   : > { %481 = vperm.xlu1 %1826, %v230_v30  }
  0x7a   : > { %509 = vperm.xlu0 %1839, %v2036_v37  }
  0x7c   : > { %1827 = vset.pattern.permute.xlu1 %v1913_v20 }
  0x7d   : > { %281 = vperm.xlu1 %1827, %v2016_v9  }
  0x7e   : > { %513 = vperm.xlu0 %1839, %v2041_v38  }
  0x81   : > { %1828 = vset.pattern.permute.xlu1 %v1911_v1 }
  0x82   : > { %1845 = vset.pattern.permute.xlu0 %v1911_v1  ;;  %389 = vperm.xlu1 %1828, %v232_v36  }
  0x83   : > { %373 = vperm.xlu0 %1845, %v2012_v4   ;;  %v2110_v4 = vrot.slane %v242_v54, %v630_v59 }
  0x86   : > { %1829 = vset.pattern.permute.xlu1 %v1910_v0 }
  0x87   : > { %393 = vperm.xlu0 %1845, %v2016_v9   ;;  %581 = vperm.xlu1 %1829, %v230_v30  }
  0x8b   : > { %585 = vperm.xlu1 %1829, %v231_v34   ;;  %397 = vperm.xlu0 %1845, %v2021_v15  }
  0x8f   : > { %1830 = vset.pattern.permute.xlu1 %v1913_v20  ;;  %417 = vperm.xlu0 %1845, %v2058_v39  }
  0x90   : > { %286 = vperm.xlu1 %1830, %v2021_v15  }
  0x93   : > { %421 = vperm.xlu0 %1845, %v2065_v41  }
  0x94   : > { %291 = vperm.xlu1 %1830, %v235_v40  }
  0x97   : > { %1849 = vset.pattern.permute.xlu0 %v1910_v0 }
  0x98   : > { %1831 = vset.pattern.permute.xlu1 %v1912_v14  ;;  %617 = vperm.xlu0 %1849, %v2058_v39  }
  0x99   : > { %493 = vperm.xlu1 %1831, %v2016_v9  }
  0x9c   : > { %621 = vperm.xlu0 %1849, %v2065_v41  }
  0x9d   : > { %1832 = vset.pattern.permute.xlu1 %v1910_v0 }
  0x9e   : > { %589 = vperm.xlu1 %1832, %v232_v36  }
  0xa2   : > { %1833 = vset.pattern.permute.xlu1 %v1911_v1 }
  0xa3   : > { %401 = vperm.xlu1 %1833, %v235_v40  }
  0xa7   : > { %1834 = vset.pattern.permute.xlu1 %v1913_v20 }
  0xa8   : > { %296 = vperm.xlu1 %1834, %v236_v42  }
  0xac   : > { %1835 = vset.pattern.permute.xlu1 %v1912_v14 }
  0xad   : > { %497 = vperm.xlu1 %1835, %v2021_v15  }
  0xb1   : > { %501 = vperm.xlu1 %1835, %v235_v40  }
  0xb5   : > { %1836 = vset.pattern.permute.xlu1 %v1911_v1 }
  0xb6   : > { %405 = vperm.xlu1 %1836, %v236_v42  }
  0xba   : > { %409 = vperm.xlu1 %1836, %v2036_v37  }
  0xbe   : > { %1838 = vset.pattern.permute.xlu1 %v1910_v0 }
  0xbf   : > { %601 = vperm.xlu1 %1838, %v235_v40   ;;  %v366_v43 = vpop.permute.xlu1 %365  ;;  %v570_v44 = vpop.permute.xlu0 %569 }
  0xc0   : > { %v432_v3 = vmul.f32 %v2098_v58, %v366_v43  ;;  %v633_v18 = vmul.f32 %v2110_v4, %v570_v44 }
  0xc3   : > { %1840 = vset.pattern.permute.xlu1 %v1912_v14  ;;  %v370_v46 = vpop.permute.xlu1 %369  ;;  %v2083_v47 = vpop.permute.xlu0 %573 }
  0xc4   : > { %505 = vperm.xlu1 %1840, %v236_v42   ;;  %v433_v11 = vmul.f32 %v2098_v58, %v370_v46 }
  0xc7   : > { %v2085_v49 = vpop.permute.xlu0 %593 }
  0xc8   : > { %1841 = vset.pattern.permute.xlu1 %v1913_v20  ;;  %v466_v50 = vpop.permute.xlu1 %465 }
  0xc9   : > { %311 = vperm.xlu1 %1841, %v2058_v39   ;;  %v532_v7 = vmul.f32 %v2105_v62, %v466_v50 }
  0xcb   : > { %v2089_v53 = vpop.permute.xlu0 %597 }
  0xcc   : > { %v470_v55 = vpop.permute.xlu1 %469 }
  0xcd   : > { %1842 = vset.pattern.permute.xlu1 %v1911_v1  ;;  %v533_v19 = vmul.f32 %v2105_v62, %v470_v55 }
  0xce   : > { %413 = vperm.xlu1 %1842, %v2041_v38  }
  0xd0   : > { %v247_v61 = vpop.permute.xlu0 %246 }
  0xd1   : > { %v328_v63 = vmul.f32 %v2095_v57, %v247_v61  ;;  %v566_v2 = vpop.permute.xlu1 %565 }
  0xd2   : > { %1843 = vset.pattern.permute.xlu1 %v1910_v0  ;;  %v632_v13 = vmul.f32 %v2110_v4, %v566_v2 }
  0xd3   : > { %v348_v5 = vadd.f32 %v2103_v60, %v328_v63  ;;  %605 = vperm.xlu1 %1843, %v236_v42  }
  0xd4   : > { %v252_v6 = vpop.permute.xlu0 %251 }
  0xd5   : > { %v448_v8 = vadd.f32 %v432_v3, %v348_v5  ;;  %v329_v9 = vmul.f32 %v2095_v57, %v252_v6  ;;  %v634_v5 = vmul.f32 %v2110_v4, %v2083_v47  ;;  %v933_v47 = vld [vmem:[#allocation4 + $0xa0] sm:$0xff] }
  0xd6   : > { %v378_v10 = vpop.permute.xlu1 %377 }
  0xd7   : > { %v548_v12 = vadd.f32 %v532_v7, %v448_v8  ;;  %v349_v15 = vadd.f32 %v2103_v60, %v329_v9  ;;  %609 = vperm.xlu1 %1843, %v2036_v37   ;;  %v435_v50 = vmul.f32 %v2098_v58, %v378_v10  ;;  %v929_v9 = vld [vmem:[#allocation4 + $0x80] sm:$0xff]  ;;  %v930_v10 = vld [vmem:[#allocation4 + $0x88] sm:$0xff] }
  0xd8   : > { %v257_v16 = vpop.permute.xlu0 %256 }
  0xd9   : > { %v648_v21 = vadd.f32 %v632_v13, %v548_v12  ;;  %v449_v22 = vadd.f32 %v433_v11, %v349_v15  ;;  %v931_v11 = vld [vmem:[#allocation4 + $0x90] sm:$0xff] }
  0xdb   : > { %v549_v23 = vadd.f32 %v533_v19, %v449_v22  ;;  %1844 = vset.pattern.permute.xlu1 %v1913_v20  ;;  %v267_v24 = vpop.permute.xlu1 %266  ;;  %vm664_vm0 = vcmp.ge.f32.partialorder %v648_v21, 0.0  ;;  %v681_v25 = vmul.f32 %v2119_v17, %v648_v21 }
  0xdc   : > { %v262_v26 = vpop.permute.xlu0 %261  ;;  %316 = vperm.xlu1 %1844, %v2065_v41  }
  0xdd   : > { %v697_v27 = vsel %vm664_vm0, %v648_v21, %v681_v25  ;;  %v649_v29 = vadd.f32 %v633_v18, %v549_v23  ;;  %v932_v18 = vld [vmem:[#allocation4 + $0x98] sm:$0xff] }
  0xde   : > { %1543 = vmatprep.mubr.f32.mxu0 %v697_v27  ;;  %v1715_v23 = vpack.c.bf16 %v932_v18, %v931_v11 }
  0xdf   : > { %vm665_vm1 = vcmp.ge.f32.partialorder %v649_v29, 0.0  ;;  %v682_v30 = vmul.f32 %v2119_v17, %v649_v29 }
  0xe0   : > { %321 = vperm.xlu1 %1844, %v241_v28   ;;  %v474_v31 = vpop.permute.xlu1 %473  ;;  %v272_v32 = vpop.permute.xlu0 %271 }
  0xe1   : > { %v698_v33 = vsel %vm665_vm1, %v649_v29, %v682_v30  ;;  %v333_v51 = vmul.f32 %v2095_v57, %v272_v32  ;;  %v534_v12 = vmul.f32 %v2105_v62, %v474_v31 }
  0xe2   : > { %1544 = vmatmul.mubr.f32.vlgmr.msra.gmra.mrb[0].mxu0 %v698_v33 }
  0xe3   : > { %v353_v6 = vadd.f32 %v2103_v60, %v333_v51  ;;  %v938_v51 = vld [vmem:[#allocation4 + $0xc8] sm:$0xff] }
  0xe4   : > { %1846 = vset.pattern.permute.xlu1 %v1912_v14  ;;  %v478_v20 = vpop.permute.xlu1 %477  ;;  %v2129_v34 = vpop.permute.xlu0 %276 }
  0xe5   : > { %517 = vperm.xlu1 %1846, %v2058_v39   ;;  %v535_v52 = vmul.f32 %v2105_v62, %v478_v20 }
  0xe8   : > { %v2132_v35 = vpop.permute.xlu0 %301 }
  0xe9   : > { %1847 = vset.pattern.permute.xlu1 %v1910_v0  ;;  %v382_v36 = vpop.permute.xlu1 %381 }
  0xea   : > { %613 = vperm.xlu1 %1847, %v2041_v38   ;;  %v331_v38 = vmul.f32 %v2095_v57, %v262_v26 }
  0xec   : > { %v2136_v37 = vpop.permute.xlu0 %306 }
  0xed   : > { %v386_v40 = vpop.permute.xlu1 %385 }
  0xee   : > { %1848 = vset.pattern.permute.xlu1 %v1911_v1  ;;  %v330_v1 = vmul.f32 %v2095_v57, %v257_v16  ;;  %v437_v8 = vmul.f32 %v2098_v58, %v386_v40  ;;  %v1711_v16 = vpack.c.bf16 %v930_v10, %v929_v9  ;;  %v936_v40 = vld [vmem:[#allocation4 + $0xb8] sm:$0xff] }
  0xef   : > { %425 = vperm.xlu1 %1848, %v241_v28  }
  0xf0   : > { %v350_v54 = vadd.f32 %v2103_v60, %v330_v1  ;;  %1712 = vmatprep.subr.bf16.mxu1 %v1711_v16 }
  0xf1   : > { %v486_v42 = vpop.permute.xlu0 %485  ;;  %1714 = vmatpush3.bf16.msra.mxu1 %v1711_v16 }
  0xf2   : > { %v578_v43 = vpop.permute.xlu1 %577  ;;  %v537_v19 = vmul.f32 %v2105_v62, %v486_v42  ;;  %1716 = vmatprep.subr.bf16.mxu1 %v1715_v23 }
  0xf3   : > { %1850 = vset.pattern.permute.xlu1 %v1912_v14  ;;  %v351_v14 = vadd.f32 %v2103_v60, %v331_v38  ;;  %v635_v59 = vmul.f32 %v2110_v4, %v578_v43 }
  0xf4   : > { %521 = vperm.xlu1 %1850, %v2065_v41   ;;  %v332_v41 = vmul.f32 %v2095_v57, %v267_v24  ;;  %v934_v24 = vld [vmem:[#allocation4 + $0xa8] sm:$0xff] }
  0xf5   : > { %v2141_v39 = vpop.permute.xlu0 %489  ;;  %v451_v56 = vadd.f32 %v435_v50, %v351_v14  ;;  %v1719_v31 = vpack.c.bf16 %v934_v24, %v933_v47  ;;  %1718 = vmatpush3.bf16.msra.mxu1 %v1715_v23  ;;  %v937_v50 = vld [vmem:[#allocation4 + $0xc0] sm:$0xff] }
  0xf6   : > { %v352_v63 = vadd.f32 %v2103_v60, %v332_v41 }
  0xf7   : > { %v482_v44 = vpop.permute.xlu1 %481  ;;  %v551_v7 = vadd.f32 %v535_v52, %v451_v56  ;;  %1720 = vmatprep.subr.bf16.mxu1 %v1719_v31 }
  0xf8   : > { %525 = vperm.xlu1 %1850, %v241_v28   ;;  %v536_v2 = vmul.f32 %v2105_v62, %v482_v44 }
  0xf9   : > { %v2143_v45 = vpop.permute.xlu0 %509  ;;  %v651_v21 = vadd.f32 %v635_v59, %v551_v7  ;;  %1722 = vmatpush3.bf16.msra.mxu1 %v1719_v31  ;;  %v1727_v59 = vpack.c.bf16 %v938_v51, %v937_v50  ;;  %v339_v50 = vmul.f32 %v2095_v57, %v2132_v35 }
  0xfb   : > { %v684_v20 = vmul.f32 %v2119_v17, %v651_v21  ;;  %vm667_vm3 = vcmp.ge.f32.partialorder %v651_v21, 0.0 }
  0xfc   : > { %1851 = vset.pattern.permute.xlu1 %v1910_v0  ;;  %v2147_v46 = vpop.permute.xlu1 %281  ;;  %v436_v0 = vmul.f32 %v2098_v58, %v382_v36  ;;  %v935_v36 = vld [vmem:[#allocation4 + $0xb0] sm:$0xff] }
  0xfd   : > { %625 = vperm.xlu1 %1851, %v241_v28   ;;  %v2150_v48 = vpop.permute.xlu0 %513  ;;  %v453_v28 = vadd.f32 %v437_v8, %v353_v6  ;;  %v1723_v14 = vpack.c.bf16 %v936_v40, %v935_v36  ;;  %v700_v41 = vsel %vm667_vm3, %v651_v21, %v684_v20  ;;  %v640_v20 = vmul.f32 %v2110_v4, %v2089_v53  ;;  %v943_v53 = vld [vmem:[#allocation4 + $0xf0] sm:$0xff] }
  0xfe   : > { %v452_v13 = vadd.f32 %v436_v0, %v352_v63 }
  0xff   : > { %v553_v32 = vadd.f32 %v537_v19, %v453_v28  ;;  %1724 = vmatprep.subr.bf16.mxu1 %v1723_v14 }
 0x100   : > { %v552_v25 = vadd.f32 %v536_v2, %v452_v13  ;;  %v939_v2 = vld [vmem:[#allocation4 + $0xd0] sm:$0xff]  ;;  %1726 = vmatpush3.bf16.msra.mxu1 %v1723_v14 }
 0x101   : > { %v2159_v55 = vpop.permute.xlu1 %389  ;;  %1728 = vmatprep.subr.bf16.mxu1 %v1727_v59 }
 0x102   : > { %v374_v61 = vpop.permute.xlu0 %373  ;;  %v438_v10 = vmul.f32 %v2098_v58, %v2159_v55 }
 0x103   : > { %v434_v3 = vmul.f32 %v2098_v58, %v374_v61  ;;  %v334_v61 = vmul.f32 %v2095_v57, %v2129_v34 }
 0x104   : > { %1730 = vmatpush3.bf16.msra.mxu1 %v1727_v59  ;;  %v359_v59 = vadd.f32 %v2103_v60, %v339_v50 }
 0x105   : > { %v450_v15 = vadd.f32 %v434_v3, %v350_v54  ;;  %v940_v3 = vld [vmem:[#allocation4 + $0xd8] sm:$0xff]  ;;  %v354_v9 = vadd.f32 %v2103_v60, %v334_v61  ;;  %v543_v61 = vmul.f32 %v2105_v62, %v2143_v45 }
 0x106   : > { %v582_v22 = vpop.permute.xlu1 %581  ;;  %v394_v63 = vpop.permute.xlu0 %393  ;;  %v1731_v8 = vpack.c.bf16 %v940_v3, %v939_v2 }
 0x107   : > { %v550_v26 = vadd.f32 %v534_v12, %v450_v15  ;;  %v636_v27 = vmul.f32 %v2110_v4, %v582_v22  ;;  %v439_v7 = vmul.f32 %v2098_v58, %v394_v63  ;;  %v639_v12 = vmul.f32 %v2110_v4, %v2085_v49 }
 0x108   : > { %1732 = vmatprep.subr.bf16.mxu1 %v1731_v8  ;;  %v538_v15 = vmul.f32 %v2105_v62, %v2141_v39  ;;  %v454_v16 = vadd.f32 %v438_v10, %v354_v9 }
 0x109   : > { %v652_v29 = vadd.f32 %v636_v27, %v552_v25  ;;  %v650_v30 = vadd.f32 %v634_v5, %v550_v26  ;;  %v335_v5 = vmul.f32 %v2095_v57, %v2147_v46  ;;  %1734 = vmatpush3.bf16.msra.mxu1 %v1731_v8 }
 0x10a   : > { %v586_v33 = vpop.permute.xlu1 %585  ;;  %v554_v55 = vadd.f32 %v538_v15, %v454_v16  ;;  %v398_v27 = vpop.permute.xlu0 %397 }
 0x10b   : > { %v637_v42 = vmul.f32 %v2110_v4, %v586_v33  ;;  %vm666_vm2 = vcmp.ge.f32.partialorder %v650_v30, 0.0  ;;  %v683_v43 = vmul.f32 %v2119_v17, %v650_v30  ;;  %vm668_vm4 = vcmp.ge.f32.partialorder %v652_v29, 0.0 }
 0x10c   : > { %v685_v44 = vmul.f32 %v2119_v17, %v652_v29  ;;  %v355_v34 = vadd.f32 %v2103_v60, %v335_v5 }
 0x10d   : > { %v653_v38 = vadd.f32 %v637_v42, %v553_v32  ;;  %v699_v1 = vsel %vm666_vm2, %v650_v30, %v683_v43  ;;  %v440_v30 = vmul.f32 %v2098_v58, %v398_v27 }
 0x10e   : > { %1546 = vmatprep.mubr.f32.mxu0 %v699_v1  ;;  %v701_v54 = vsel %vm668_vm4, %v652_v29, %v685_v44  ;;  %v455_v46 = vadd.f32 %v439_v7, %v355_v34  ;;  %v941_v44 = vld [vmem:[#allocation4 + $0xe0] sm:$0xff] }
 0x10f   : > { %v287_v52 = vpop.permute.xlu1 %286  ;;  %1547 = vmatmul.mubr.f32.gmra.mrb[2].mxu0 %v700_v41  ;;  %vm669_vm5 = vcmp.ge.f32.partialorder %v653_v38, 0.0  ;;  %v686_v0 = vmul.f32 %v2119_v17, %v653_v38 }
 0x110   : > { %1549 = vmatprep.mubr.f32.mxu0 %v701_v54  ;;  %v336_v26 = vmul.f32 %v2095_v57, %v287_v52  ;;  %v944_v52 = vld [vmem:[#allocation4 + $0xf8] sm:$0xff] }
 0x111   : > { %v702_v56 = vsel %vm669_vm5, %v653_v38, %v686_v0  ;;  %v942_v38 = vld [vmem:[#allocation4 + $0xe8] sm:$0xff]  ;;  %v1739_v54 = vpack.c.bf16 %v944_v52, %v943_v53 }
 0x112   : > { %v356_v29 = vadd.f32 %v2103_v60, %v336_v26  ;;  %v1735_v1 = vpack.c.bf16 %v942_v38, %v941_v44 }
 0x113   : > { %v292_v6 = vpop.permute.xlu1 %291  ;;  %1550 = vmatmul.mubr.f32.gmra.mrb[4].mxu0 %v702_v56 }
 0x114   : > { %v456_v32 = vadd.f32 %v440_v30, %v356_v29  ;;  %1736 = vmatprep.subr.bf16.mxu1 %v1735_v1  ;;  %v337_v51 = vmul.f32 %v2095_v57, %v292_v6  ;;  %v418_v30 = vpop.permute.xlu0 %417 }
 0x115   : > { %1738 = vmatpush3.bf16.msra.mxu1 %v1735_v1 }
 0x116   : > { %1740 = vmatprep.subr.bf16.mxu1 %v1739_v54  ;;  %v357_v35 = vadd.f32 %v2103_v60, %v337_v51 }
 0x118   : > { %v494_v11 = vpop.permute.xlu1 %493 }
 0x119   : > { %v539_v13 = vmul.f32 %v2105_v62, %v494_v11  ;;  %1742 = vmatpush3.bf16.msra.mxu1 %v1739_v54 }
 0x11b   : > { %v555_v18 = vadd.f32 %v539_v13, %v455_v46  ;;  %v340_v46 = vmul.f32 %v2095_v57, %v2136_v37 }
 0x11d   : > { %v655_v19 = vadd.f32 %v639_v12, %v555_v18  ;;  %v590_v21 = vpop.permute.xlu1 %589  ;;  %v360_v18 = vadd.f32 %v2103_v60, %v340_v46 }
 0x11e   : > { %v638_v22 = vmul.f32 %v2110_v4, %v590_v21 }
 0x11f   : > { %v688_v47 = vmul.f32 %v2119_v17, %v655_v19  ;;  %vm671_vm7 = vcmp.ge.f32.partialorder %v655_v19, 0.0 }
 0x120   : > { %v654_v23 = vadd.f32 %v638_v22, %v554_v55 }
 0x121   : > { %v704_v39 = vsel %vm671_vm7, %v655_v19, %v688_v47  ;;  %v544_v19 = vmul.f32 %v2105_v62, %v2150_v48 }
 0x122   : > { %v402_v24 = vpop.permute.xlu1 %401  ;;  %vm670_vm6 = vcmp.ge.f32.partialorder %v654_v23, 0.0  ;;  %v687_v49 = vmul.f32 %v2119_v17, %v654_v23 }
 0x123   : > { %v441_v0 = vmul.f32 %v2098_v58, %v402_v24 }
 0x124   : > { %v703_v25 = vsel %vm670_vm6, %v654_v23, %v687_v49 }
 0x125   : > { %1552 = vmatprep.mubr.f32.mxu0 %v703_v25  ;;  %v457_v5 = vadd.f32 %v441_v0, %v357_v35 }
 0x126   : > { %1553 = vmatmul.mubr.f32.gmra.mrb[6].mxu0 %v704_v39 }
 0x127   : > { %v297_v28 = vpop.permute.xlu1 %296 }
 0x128   : > { %v338_v13 = vmul.f32 %v2095_v57, %v297_v28 }
 0x12a   : > { %v358_v55 = vadd.f32 %v2103_v60, %v338_v13 }
 0x12c   : > { %v498_v31 = vpop.permute.xlu1 %497 }
 0x12d   : > { %v540_v33 = vmul.f32 %v2105_v62, %v498_v31 }
 0x12f   : > { %v556_v36 = vadd.f32 %v540_v33, %v456_v32 }
 0x130   : > { %v502_v40 = vpop.permute.xlu1 %501 }
 0x131   : > { %v656_v42 = vadd.f32 %v640_v20, %v556_v36  ;;  %v541_v2 = vmul.f32 %v2105_v62, %v502_v40  ;;  %v422_v36 = vpop.permute.xlu0 %421 }
 0x132   : > { %v446_v35 = vmul.f32 %v2098_v58, %v422_v36 }
 0x133   : > { %vm672_vm8 = vcmp.ge.f32.partialorder %v656_v42, 0.0  ;;  %v689_v43 = vmul.f32 %v2119_v17, %v656_v42  ;;  %v557_v8 = vadd.f32 %v541_v2, %v457_v5 }
 0x135   : > { %v406_v14 = vpop.permute.xlu1 %405  ;;  %v705_v41 = vsel %vm672_vm8, %v656_v42, %v689_v43  ;;  %v445_v43 = vmul.f32 %v2098_v58, %v418_v30  ;;  %v618_v44 = vpop.permute.xlu0 %617  ;;  %v1149_v30 = vld [vmem:[#allocation4 + $0x120] sm:$0xff] }
 0x136   : > { %1555 = vmatprep.mubr.f32.mxu0 %v705_v41  ;;  %v442_v15 = vmul.f32 %v2098_v58, %v406_v14  ;;  %v645_v41 = vmul.f32 %v2110_v4, %v618_v44  ;;  %v1152_v44 = vld [vmem:[#allocation4 + $0x138] sm:$0xff] }
 0x138   : > { %v458_v47 = vadd.f32 %v442_v15, %v358_v55 }
 0x139   : > { %v410_v56 = vpop.permute.xlu1 %409  ;;  %v622_v5 = vpop.permute.xlu0 %621 }
 0x13a   : > { %v443_v63 = vmul.f32 %v2098_v58, %v410_v56 }
 0x13c   : > { %v459_v3 = vadd.f32 %v443_v63, %v359_v59 }
 0x13e   : > { %v602_v6 = vpop.permute.xlu1 %601  ;;  %v559_v7 = vadd.f32 %v543_v61, %v459_v3 }
 0x13f   : > { %v641_v9 = vmul.f32 %v2110_v4, %v602_v6 }
 0x141   : > { %v657_v10 = vadd.f32 %v641_v9, %v557_v8  ;;  %v646_v9 = vmul.f32 %v2110_v4, %v622_v5 }
 0x143   : > { %v506_v34 = vpop.permute.xlu1 %505  ;;  %vm673_vm9 = vcmp.ge.f32.partialorder %v657_v10, 0.0  ;;  %v690_v45 = vmul.f32 %v2119_v17, %v657_v10 }
 0x144   : > { %v542_v22 = vmul.f32 %v2105_v62, %v506_v34 }
 0x145   : > { %v706_v11 = vsel %vm673_vm9, %v657_v10, %v690_v45 }
 0x146   : > { %1556 = vmatmul.mubr.f32.gmra.mrb[8].mxu0 %v706_v11  ;;  %v558_v49 = vadd.f32 %v542_v22, %v458_v47 }
 0x148   : > { %v312_v12 = vpop.permute.xlu1 %311 }
 0x149   : > { %v341_v33 = vmul.f32 %v2095_v57, %v312_v12 }
 0x14b   : > { %v361_v42 = vadd.f32 %v2103_v60, %v341_v33 }
 0x14d   : > { %v414_v16 = vpop.permute.xlu1 %413  ;;  %v461_v1 = vadd.f32 %v445_v43, %v361_v42  ;;  %v1151_v43 = vld [vmem:[#allocation4 + $0x130] sm:$0xff] }
 0x14e   : > { %v444_v21 = vmul.f32 %v2098_v58, %v414_v16 }
 0x150   : > { %v460_v23 = vadd.f32 %v444_v21, %v360_v18 }
 0x152   : > { %v606_v24 = vpop.permute.xlu1 %605  ;;  %v560_v37 = vadd.f32 %v544_v19, %v460_v23  ;;  %v2252_v23 = vstv %s1407_s26 }
 0x153   : > { %v642_v25 = vmul.f32 %v2110_v4, %v606_v24 }
 0x155   : > { %v658_v26 = vadd.f32 %v642_v25, %v558_v49 }
 0x156   : > { %v610_v39 = vpop.permute.xlu1 %609 }
 0x157   : > { %v643_v27 = vmul.f32 %v2110_v4, %v610_v39  ;;  %vm674_vm10 = vcmp.ge.f32.partialorder %v658_v26, 0.0  ;;  %v691_v48 = vmul.f32 %v2119_v17, %v658_v26  ;;  %v1146_v39 = vld [vmem:[#allocation4 + $0x108] sm:$0xff] }
 0x159   : > { %v659_v28 = vadd.f32 %v643_v27, %v559_v7  ;;  %v707_v29 = vsel %vm674_vm10, %v658_v26, %v691_v48  ;;  %v1145_v26 = vld [vmem:[#allocation4 + $0x100] sm:$0xff]  ;;  %v1147_v27 = vld [vmem:[#allocation4 + $0x110] sm:$0xff] }
 0x15a   : > { %1558 = vmatprep.mubr.f32.mxu0 %v707_v29  ;;  %v1743_v48 = vpack.c.bf16 %v1146_v39, %v1145_v26 }
 0x15b   : > { %v317_v31 = vpop.permute.xlu1 %316  ;;  %vm675_vm11 = vcmp.ge.f32.partialorder %v659_v28, 0.0  ;;  %v692_v32 = vmul.f32 %v2119_v17, %v659_v28 }
 0x15c   : > { %v342_v54 = vmul.f32 %v2095_v57, %v317_v31  ;;  %v1150_v31 = vld [vmem:[#allocation4 + $0x128] sm:$0xff]  ;;  %1744 = vmatprep.subr.bf16.mxu0 %v1743_v48  ;;  %1775 = vmatprep.subr.bf16.mxu1 %v1743_v48 }
 0x15d   : > { %v708_v20 = vsel %vm675_vm11, %v659_v28, %v692_v32  ;;  %v1148_v28 = vld [vmem:[#allocation4 + $0x118] sm:$0xff]  ;;  %1746 = vmatpush3.bf16.msra.mxu0 %v1743_v48 }
 0x15e   : > { %1559 = vmatmul.mubr.f32.gmra.mrb[10].mxu0 %v708_v20  ;;  %v362_v63 = vadd.f32 %v2103_v60, %v342_v54  ;;  %v1747_v29 = vpack.c.bf16 %v1148_v28, %v1147_v27 }
 0x15f   : > { %v322_v40 = vpop.permute.xlu1 %321 }
 0x160   : > { %v462_v7 = vadd.f32 %v446_v35, %v362_v63  ;;  %v343_v10 = vmul.f32 %v2095_v57, %v322_v40  ;;  %1748 = vmatprep.subr.bf16.mxu0 %v1747_v29  ;;  %v1751_v40 = vpack.c.bf16 %v1150_v31, %v1149_v30 }
 0x161   : > { %1750 = vmatpush3.bf16.msra.mxu0 %v1747_v29 }
 0x162   : > { %v363_v46 = vadd.f32 %v2103_v60, %v343_v10  ;;  %v2250_v60 = vld [vmem:[%s2374_s4 + $0x1] ss:$0 sm:$0xff]  ;;  %1752 = vmatprep.subr.bf16.mxu0 %v1751_v40 }
 0x164   : > { %v518_v38 = vpop.permute.xlu1 %517 }
 0x165   : > { %v545_v14 = vmul.f32 %v2105_v62, %v518_v38  ;;  %1754 = vmatpush3.bf16.msra.mxu0 %v1751_v40 }
 0x167   : > { %v561_v50 = vadd.f32 %v545_v14, %v461_v1 }
 0x169   : > { %v661_v51 = vadd.f32 %v645_v41, %v561_v50  ;;  %v614_v53 = vpop.permute.xlu1 %613 }
 0x16a   : > { %v644_v52 = vmul.f32 %v2110_v4, %v614_v53  ;;  %v1755_v53 = vpack.c.bf16 %v1152_v44, %v1151_v43 }
 0x16b   : > { %v694_v56 = vmul.f32 %v2119_v17, %v661_v51  ;;  %vm677_vm13 = vcmp.ge.f32.partialorder %v661_v51, 0.0 }
 0x16c   : > { %v660_v0 = vadd.f32 %v644_v52, %v560_v37  ;;  %1756 = vmatprep.subr.bf16.mxu0 %v1755_v53 }
 0x16d   : > { %v710_v3 = vsel %vm677_vm13, %v661_v51, %v694_v56  ;;  %v1154_v56 = vld [vmem:[#allocation4 + $0x148] sm:$0xff]  ;;  %1758 = vmatpush3.bf16.msra.mxu0 %v1755_v53 }
 0x16e   : > { %v426_v59 = vpop.permute.xlu1 %425  ;;  %vm676_vm12 = vcmp.ge.f32.partialorder %v660_v0, 0.0  ;;  %v693_v61 = vmul.f32 %v2119_v17, %v660_v0 }
 0x16f   : > { %v447_v45 = vmul.f32 %v2098_v58, %v426_v59 }
 0x170   : > { %v709_v2 = vsel %vm676_vm12, %v660_v0, %v693_v61  ;;  %v1153_v0 = vld [vmem:[#allocation4 + $0x140] sm:$0xff] }
 0x171   : > { %1561 = vmatprep.mubr.f32.mxu0 %v709_v2  ;;  %v463_v16 = vadd.f32 %v447_v45, %v363_v46  ;;  %v1759_v63 = vpack.c.bf16 %v1154_v56, %v1153_v0  ;;  %v1155_v2 = vld [vmem:[#allocation4 + $0x150] sm:$0xff]  ;;  %v1158_v46 = vld [vmem:[#allocation4 + $0x168] sm:$0xff] }
 0x172   : > { %1562 = vmatmul.mubr.f32.gmra.mrb[12].mxu0 %v710_v3  ;;  %v1156_v3 = vld [vmem:[#allocation4 + $0x158] sm:$0xff] }
 0x173   : > { %v522_v6 = vpop.permute.xlu1 %521  ;;  %1760 = vmatprep.subr.bf16.mxu0 %v1759_v63  ;;  %v1763_v5 = vpack.c.bf16 %v1156_v3, %v1155_v2 }
 0x174   : > { %v546_v8 = vmul.f32 %v2105_v62, %v522_v6  ;;  %1762 = vmatpush3.bf16.msra.mxu0 %v1759_v63 }
 0x175   : > { %1764 = vmatprep.subr.bf16.mxu0 %v1763_v5 }
 0x176   : > { %v562_v34 = vadd.f32 %v546_v8, %v462_v7 }
 0x177   : > { %v526_v11 = vpop.permute.xlu1 %525 }
 0x178   : > { %v662_v12 = vadd.f32 %v646_v9, %v562_v34  ;;  %v547_v13 = vmul.f32 %v2105_v62, %v526_v11  ;;  %1766 = vmatpush3.bf16.msra.mxu0 %v1763_v5 }
 0x17a   : > { %vm678_vm14 = vcmp.ge.f32.partialorder %v662_v12, 0.0  ;;  %v695_v15 = vmul.f32 %v2119_v17, %v662_v12  ;;  %v563_v21 = vadd.f32 %v547_v13, %v463_v16  ;;  %v1160_v16 = vld [vmem:[#allocation4 + $0x178] sm:$0xff] }
 0x17c   : > { %v626_v18 = vpop.permute.xlu1 %625  ;;  %v711_v19 = vsel %vm678_vm14, %v662_v12, %v695_v15  ;;  %v1157_v12 = vld [vmem:[#allocation4 + $0x160] sm:$0xff]  ;;  %v1159_v15 = vld [vmem:[#allocation4 + $0x170] sm:$0xff] }
 0x17d   : > { %v647_v55 = vmul.f32 %v2110_v4, %v626_v18  ;;  %1564 = vmatprep.mubr.f32.mxu0 %v711_v19  ;;  %v1767_v13 = vpack.c.bf16 %v1158_v46, %v1157_v12  ;;  %v1771_v18 = vpack.c.bf16 %v1160_v16, %v1159_v15 }
 0x17f   : > { %v663_v57 = vadd.f32 %v647_v55, %v563_v21  ;;  %1768 = vmatprep.subr.bf16.mxu0 %v1767_v13 }
 0x180   : > { %1770 = vmatpush3.bf16.msra.mxu0 %v1767_v13 }
 0x181   : > { %vm679_vm15 = vcmp.ge.f32.partialorder %v663_v57, 0.0  ;;  %v696_v58 = vmul.f32 %v2119_v17, %v663_v57  ;;  %1772 = vmatprep.subr.bf16.mxu0 %v1771_v18 }
 0x183   : > { %v712_v22 = vsel %vm679_vm15, %v663_v57, %v696_v58 }
 0x184   : > { %1565 = vmatmul.mubr.f32.gmra.mrb[14].mxu0 %v712_v22 }
 0x185   : > { %1774 = vmatpush3.bf16.msra.mxu0 %v1771_v18 }
 0x1b5   : > { %v1545_v62 = vpop.f32.mrb[0].mxu0 }
 0x1b6   : > { %v806_v47 = vadd.f32 %v1545_v62, %v2250_v60  ;;  %v800_v24 = vpop.f32.mrb[1].mxu0 }
 0x1b7   : > { %v801_v4 = vadd.f32 %v2250_v60, %v800_v24 }
 0x1b8   : > { %v897_v37 = vmul.f32 %v2252_v23, %v806_v47  ;;  %vm880_vm1 = vcmp.ge.f32.partialorder %v806_v47, 0.0 }
 0x1b9   : > { %vm879_vm0 = vcmp.ge.f32.partialorder %v801_v4, 0.0  ;;  %v896_v17 = vmul.f32 %v2252_v23, %v801_v4 }
 0x1ba   : > { %v913_v25 = vsel %vm880_vm1, %v806_v47, %v897_v37 }
 0x1bb   : > { %v912_v49 = vsel %vm879_vm0, %v801_v4, %v896_v17 }
 0x1bc   : > { %1599 = vmatprep.mubr.f32.mxu1 %v912_v49 }
 0x1bd   : > { %1600 = vmatmul.mubr.f32.vlgmr.msra.gmra.mrb[0].mxu1 %v913_v25 }
 0x1be   : > { %1783 = vmatpush3.bf16.msra.mxu1 %v1743_v48 }
 0x1bf   : > { %1776 = vmatprep.subr.bf16.mxu1 %v1747_v29 }
 0x1c2   : > { %1784 = vmatpush3.bf16.msra.mxu1 %v1747_v29 }
 0x1c3   : > { %1777 = vmatprep.subr.bf16.mxu1 %v1751_v40 }
 0x1c6   : > { %1785 = vmatpush3.bf16.msra.mxu1 %v1751_v40 }
 0x1c7   : > { %1778 = vmatprep.subr.bf16.mxu1 %v1755_v53 }
 0x1ca   : > { %1786 = vmatpush3.bf16.msra.mxu1 %v1755_v53 }
 0x1cb   : > { %1779 = vmatprep.subr.bf16.mxu1 %v1759_v63 }
 0x1ce   : > { %1787 = vmatpush3.bf16.msra.mxu1 %v1759_v63 }
 0x1cf   : > { %1780 = vmatprep.subr.bf16.mxu1 %v1763_v5 }
 0x1d2   : > { %1788 = vmatpush3.bf16.msra.mxu1 %v1763_v5 }
 0x1d3   : > { %1781 = vmatprep.subr.bf16.mxu1 %v1767_v13 }
 0x1d6   : > { %1789 = vmatpush3.bf16.msra.mxu1 %v1767_v13 }
 0x1d7   : > { %1782 = vmatprep.subr.bf16.mxu1 %v1771_v18 }
 0x1da   : > { %1790 = vmatpush3.bf16.msra.mxu1 %v1771_v18 }
 0x1e2   : > { %v1548_v32 = vpop.f32.mrb[2].mxu0 }
 0x1e3   : > { %v816_v33 = vadd.f32 %v1548_v32, %v2250_v60  ;;  %v810_v20 = vpop.f32.mrb[3].mxu0 }
 0x1e4   : > { %v811_v36 = vadd.f32 %v2250_v60, %v810_v20 }
 0x1e5   : > { %v899_v42 = vmul.f32 %v2252_v23, %v816_v33  ;;  %vm882_vm3 = vcmp.ge.f32.partialorder %v816_v33, 0.0 }
 0x1e6   : > { %v898_v38 = vmul.f32 %v2252_v23, %v811_v36  ;;  %v1551_v1 = vpop.f32.mrb[4].mxu0  ;;  %vm881_vm2 = vcmp.ge.f32.partialorder %v811_v36, 0.0 }
 0x1e7   : > { %v826_v14 = vadd.f32 %v1551_v1, %v2250_v60  ;;  %v820_v41 = vpop.f32.mrb[5].mxu0  ;;  %v915_v54 = vsel %vm882_vm3, %v816_v33, %v899_v42 }
 0x1e8   : > { %v821_v50 = vadd.f32 %v2250_v60, %v820_v41  ;;  %v914_v51 = vsel %vm881_vm2, %v811_v36, %v898_v38 }
 0x1e9   : > { %v901_v52 = vmul.f32 %v2252_v23, %v826_v14  ;;  %1602 = vmatprep.mubr.f32.mxu1 %v914_v51  ;;  %vm884_vm5 = vcmp.ge.f32.partialorder %v826_v14, 0.0 }
 0x1ea   : > { %v900_v59 = vmul.f32 %v2252_v23, %v821_v50  ;;  %1603 = vmatmul.mubr.f32.gmra.mrb[2].mxu1 %v915_v54  ;;  %vm883_vm4 = vcmp.ge.f32.partialorder %v821_v50, 0.0 }
 0x1eb   : > { %v917_v35 = vsel %vm884_vm5, %v826_v14, %v901_v52  ;;  %v2289_v14 = vld [vmem:[%s2374_s4 + $0x2] ss:$0 sm:$0xff] }
 0x1ec   : > { %v916_v61 = vsel %vm883_vm4, %v821_v50, %v900_v59  ;;  %v2291_v50 = vstv %s1408_s29 }
 0x1ed   : > { %1605 = vmatprep.mubr.f32.mxu1 %v916_v61 }
 0x1ee   : > { %1606 = vmatmul.mubr.f32.gmra.mrb[4].mxu1 %v917_v35 }
 0x1f9   : > { %v1554_v6 = vpop.f32.mrb[6].mxu0 }
 0x1fa   : > { %v836_v7 = vadd.f32 %v1554_v6, %v2250_v60  ;;  %v830_v8 = vpop.f32.mrb[7].mxu0 }
 0x1fb   : > { %v831_v9 = vadd.f32 %v2250_v60, %v830_v8 }
 0x1fc   : > { %v903_v10 = vmul.f32 %v2252_v23, %v836_v7  ;;  %vm886_vm7 = vcmp.ge.f32.partialorder %v836_v7, 0.0 }
 0x1fd   : > { %v902_v34 = vmul.f32 %v2252_v23, %v831_v9  ;;  %vm885_vm6 = vcmp.ge.f32.partialorder %v831_v9, 0.0 }
 0x1fe   : > { %v919_v11 = vsel %vm886_vm7, %v836_v7, %v903_v10 }
 0x1ff   : > { %v918_v45 = vsel %vm885_vm6, %v831_v9, %v902_v34 }
 0x200   : > { %1608 = vmatprep.mubr.f32.mxu1 %v918_v45 }
 0x201   : > { %1609 = vmatmul.mubr.f32.gmra.mrb[6].mxu1 %v919_v11 }
 0x219   : > { %v1557_v19 = vpop.f32.mrb[8].mxu0 }
 0x21a   : > { %v846_v21 = vadd.f32 %v1557_v19, %v2250_v60  ;;  %v840_v55 = vpop.f32.mrb[9].mxu0 }
 0x21b   : > { %v841_v57 = vadd.f32 %v2250_v60, %v840_v55 }
 0x21c   : > { %v905_v58 = vmul.f32 %v2252_v23, %v846_v21  ;;  %vm888_vm9 = vcmp.ge.f32.partialorder %v846_v21, 0.0 }
 0x21d   : > { %v904_v22 = vmul.f32 %v2252_v23, %v841_v57  ;;  %vm887_vm8 = vcmp.ge.f32.partialorder %v841_v57, 0.0 }
 0x21e   : > { %v921_v47 = vsel %vm888_vm9, %v846_v21, %v905_v58 }
 0x21f   : > { %v920_v62 = vsel %vm887_vm8, %v841_v57, %v904_v22 }
 0x220   : > { %1611 = vmatprep.mubr.f32.mxu1 %v920_v62 }
 0x221   : > { %1612 = vmatmul.mubr.f32.gmra.mrb[8].mxu1 %v921_v47 }
 0x231   : > { %v1560_v24 = vpop.f32.mrb[10].mxu0 }
 0x232   : > { %v856_v4 = vadd.f32 %v1560_v24, %v2250_v60  ;;  %v850_v37 = vpop.f32.mrb[11].mxu0 }
 0x233   : > { %v851_v17 = vadd.f32 %v2250_v60, %v850_v37 }
 0x234   : > { %v907_v49 = vmul.f32 %v2252_v23, %v856_v4  ;;  %vm890_vm11 = vcmp.ge.f32.partialorder %v856_v4, 0.0 }
 0x235   : > { %v906_v25 = vmul.f32 %v2252_v23, %v851_v17  ;;  %vm889_vm10 = vcmp.ge.f32.partialorder %v851_v17, 0.0 }
 0x236   : > { %v923_v39 = vsel %vm890_vm11, %v856_v4, %v907_v49 }
 0x237   : > { %v922_v26 = vsel %vm889_vm10, %v851_v17, %v906_v25 }
 0x238   : > { %1614 = vmatprep.mubr.f32.mxu1 %v922_v26 }
 0x239   : > { %1615 = vmatmul.mubr.f32.gmra.mrb[10].mxu1 %v923_v39 }
 0x245   : > { %v1563_v27 = vpop.f32.mrb[12].mxu0 }
 0x246   : > { %v866_v48 = vadd.f32 %v1563_v27, %v2250_v60  ;;  %v860_v28 = vpop.f32.mrb[13].mxu0 }
 0x247   : > { %v861_v29 = vadd.f32 %v2250_v60, %v860_v28 }
 0x248   : > { %v909_v30 = vmul.f32 %v2252_v23, %v866_v48  ;;  %vm892_vm13 = vcmp.ge.f32.partialorder %v866_v48, 0.0 }
 0x249   : > { %v908_v31 = vmul.f32 %v2252_v23, %v861_v29  ;;  %vm891_vm12 = vcmp.ge.f32.partialorder %v861_v29, 0.0 }
 0x24a   : > { %v925_v33 = vsel %vm892_vm13, %v866_v48, %v909_v30 }
 0x24b   : > { %v924_v32 = vsel %vm891_vm12, %v861_v29, %v908_v31 }
 0x24c   : > { %1617 = vmatprep.mubr.f32.mxu1 %v924_v32 }
 0x24d   : > { %1618 = vmatmul.mubr.f32.gmra.mrb[12].mxu1 %v925_v33 }
 0x257   : > { %v1566_v20 = vpop.f32.mrb[14].mxu0 }
 0x258   : > { %v876_v36 = vadd.f32 %v1566_v20, %v2250_v60  ;;  %v870_v40 = vpop.f32.mrb[15].mxu0 }
 0x259   : > { %v871_v42 = vadd.f32 %v2250_v60, %v870_v40 }
 0x25a   : > { %v911_v43 = vmul.f32 %v2252_v23, %v876_v36  ;;  %vm894_vm15 = vcmp.ge.f32.partialorder %v876_v36, 0.0 }
 0x25b   : > { %v910_v44 = vmul.f32 %v2252_v23, %v871_v42  ;;  %vm893_vm14 = vcmp.ge.f32.partialorder %v871_v42, 0.0 }
 0x25c   : > { %v927_v1 = vsel %vm894_vm15, %v876_v36, %v911_v43 }
 0x25d   : > { %v926_v38 = vsel %vm893_vm14, %v871_v42, %v910_v44 }
 0x25e   : > { %1620 = vmatprep.mubr.f32.mxu1 %v926_v38 }
 0x25f   : > { %1621 = vmatmul.mubr.f32.gmra.mrb[14].mxu1 %v927_v1 }
 0x290   : > { %v1601_v41 = vpop.f32.mrb[0].mxu1 }
 0x291   : > { %v1022_v60 = vadd.f32 %v1601_v41, %v2289_v14  ;;  %v1016_v51 = vpop.f32.mrb[1].mxu1 }
 0x292   : > { %v1017_v23 = vadd.f32 %v2289_v14, %v1016_v51  ;;  %v1412_v51 = vld [vmem:[%s2374_s4 + $0x3] ss:$0 sm:$0xff] }
 0x293   : > { %v1113_v53 = vmul.f32 %v2291_v50, %v1022_v60  ;;  %vm1096_vm0 = vcmp.ge.f32.partialorder %v1022_v60, 0.0 }
 0x294   : > { %v1112_v52 = vmul.f32 %v2291_v50, %v1017_v23  ;;  %vm1095_vm1 = vcmp.ge.f32.partialorder %v1017_v23, 0.0 }
 0x295   : > { %v1129_v0 = vsel %vm1096_vm0, %v1022_v60, %v1113_v53  ;;  %vm1311_vm0 = vcmask 15360  }
 0x296   : > { %v1128_v54 = vsel %vm1095_vm1, %v1017_v23, %v1112_v52 }
 0x297   : > { %1655 = vmatprep.mubr.f32.mxu0 %v1128_v54 }
 0x298   : > { %1656 = vmatmul.mubr.f32.vlgmr.msra.gmra.mrb[16].mxu0 %v1129_v0 }
 0x2bd   : > { %v1604_v56 = vpop.f32.mrb[2].mxu1 }
 0x2be   : > { %v1032_v59 = vadd.f32 %v1604_v56, %v2289_v14  ;;  %v1026_v61 = vpop.f32.mrb[3].mxu1 }
 0x2bf   : > { %v1027_v63 = vadd.f32 %v2289_v14, %v1026_v61 }
 0x2c0   : > { %v1115_v35 = vmul.f32 %v2291_v50, %v1032_v59  ;;  %vm1098_vm3 = vcmp.ge.f32.partialorder %v1032_v59, 0.0 }
 0x2c1   : > { %v1114_v2 = vmul.f32 %v2291_v50, %v1027_v63  ;;  %v1607_v3 = vpop.f32.mrb[4].mxu1  ;;  %vm1097_vm2 = vcmp.ge.f32.partialorder %v1027_v63, 0.0 }
 0x2c2   : > { %v1042_v5 = vadd.f32 %v1607_v3, %v2289_v14  ;;  %v1036_v6 = vpop.f32.mrb[5].mxu1  ;;  %v1131_v10 = vsel %vm1098_vm3, %v1032_v59, %v1115_v35 }
 0x2c3   : > { %v1037_v7 = vadd.f32 %v2289_v14, %v1036_v6  ;;  %v1130_v8 = vsel %vm1097_vm2, %v1027_v63, %v1114_v2 }
 0x2c4   : > { %v1117_v9 = vmul.f32 %v2291_v50, %v1042_v5  ;;  %1658 = vmatprep.mubr.f32.mxu0 %v1130_v8  ;;  %vm1100_vm5 = vcmp.ge.f32.partialorder %v1042_v5, 0.0 }
 0x2c5   : > { %v1116_v34 = vmul.f32 %v2291_v50, %v1037_v7  ;;  %1659 = vmatmul.mubr.f32.gmra.mrb[18].mxu0 %v1131_v10  ;;  %vm1099_vm4 = vcmp.ge.f32.partialorder %v1037_v7, 0.0 }
 0x2c6   : > { %v1133_v11 = vsel %vm1100_vm5, %v1042_v5, %v1117_v9 }
 0x2c7   : > { %v1132_v45 = vsel %vm1099_vm4, %v1037_v7, %v1116_v34 }
 0x2c8   : > { %1661 = vmatprep.mubr.f32.mxu0 %v1132_v45 }
 0x2c9   : > { %1662 = vmatmul.mubr.f32.gmra.mrb[20].mxu0 %v1133_v11 }
 0x2d4   : > { %v1610_v12 = vpop.f32.mrb[6].mxu1 }
 0x2d5   : > { %v1052_v46 = vadd.f32 %v1610_v12, %v2289_v14  ;;  %v1046_v13 = vpop.f32.mrb[7].mxu1 }
 0x2d6   : > { %v1047_v15 = vadd.f32 %v2289_v14, %v1046_v13 }
 0x2d7   : > { %v1119_v16 = vmul.f32 %v2291_v50, %v1052_v46  ;;  %vm1102_vm7 = vcmp.ge.f32.partialorder %v1052_v46, 0.0 }
 0x2d8   : > { %v1118_v18 = vmul.f32 %v2291_v50, %v1047_v15  ;;  %vm1101_vm6 = vcmp.ge.f32.partialorder %v1047_v15, 0.0 }
 0x2d9   : > { %v1135_v21 = vsel %vm1102_vm7, %v1052_v46, %v1119_v16 }
 0x2da   : > { %v1134_v19 = vsel %vm1101_vm6, %v1047_v15, %v1118_v18 }
 0x2db   : > { %1664 = vmatprep.mubr.f32.mxu0 %v1134_v19 }
 0x2dc   : > { %1665 = vmatmul.mubr.f32.gmra.mrb[22].mxu0 %v1135_v21 }
 0x2f4   : > { %v1613_v55 = vpop.f32.mrb[8].mxu1 }
 0x2f5   : > { %v1062_v57 = vadd.f32 %v1613_v55, %v2289_v14  ;;  %v1056_v58 = vpop.f32.mrb[9].mxu1 }
 0x2f6   : > { %v1057_v22 = vadd.f32 %v2289_v14, %v1056_v58 }
 0x2f7   : > { %v1121_v62 = vmul.f32 %v2291_v50, %v1062_v57  ;;  %vm1104_vm8 = vcmp.ge.f32.partialorder %v1062_v57, 0.0 }
 0x2f8   : > { %v1120_v47 = vmul.f32 %v2291_v50, %v1057_v22  ;;  %vm1103_vm9 = vcmp.ge.f32.partialorder %v1057_v22, 0.0 }
 0x2f9   : > { %v1137_v4 = vsel %vm1104_vm8, %v1062_v57, %v1121_v62 }
 0x2fa   : > { %v1136_v24 = vsel %vm1103_vm9, %v1057_v22, %v1120_v47 }
 0x2fb   : > { %1667 = vmatprep.mubr.f32.mxu1 %v1136_v24 }
 0x2fc   : > { %1668 = vmatmul.mubr.f32.vlgmr.msra.gmra.mrb[16].mxu1 %v1137_v4 }
 0x30c   : > { %v1616_v37 = vpop.f32.mrb[10].mxu1 }
 0x30d   : > { %v1072_v17 = vadd.f32 %v1616_v37, %v2289_v14  ;;  %v1066_v49 = vpop.f32.mrb[11].mxu1 }
 0x30e   : > { %v1067_v25 = vadd.f32 %v2289_v14, %v1066_v49 }
 0x30f   : > { %v1123_v26 = vmul.f32 %v2291_v50, %v1072_v17  ;;  %vm1106_vm11 = vcmp.ge.f32.partialorder %v1072_v17, 0.0 }
 0x310   : > { %v1122_v39 = vmul.f32 %v2291_v50, %v1067_v25  ;;  %vm1105_vm10 = vcmp.ge.f32.partialorder %v1067_v25, 0.0 }
 0x311   : > { %v1139_v48 = vsel %vm1106_vm11, %v1072_v17, %v1123_v26 }
 0x312   : > { %v1138_v27 = vsel %vm1105_vm10, %v1067_v25, %v1122_v39 }
 0x313   : > { %1670 = vmatprep.mubr.f32.mxu1 %v1138_v27 }
 0x314   : > { %1671 = vmatmul.mubr.f32.gmra.mrb[18].mxu1 %v1139_v48 }
 0x320   : > { %v1619_v28 = vpop.f32.mrb[12].mxu1 }
 0x321   : > { %v1082_v29 = vadd.f32 %v1619_v28, %v2289_v14  ;;  %v1076_v30 = vpop.f32.mrb[13].mxu1 }
 0x322   : > { %v1077_v31 = vadd.f32 %v2289_v14, %v1076_v30 }
 0x323   : > { %v1125_v32 = vmul.f32 %v2291_v50, %v1082_v29  ;;  %vm1108_vm13 = vcmp.ge.f32.partialorder %v1082_v29, 0.0 }
 0x324   : > { %v1124_v33 = vmul.f32 %v2291_v50, %v1077_v31  ;;  %vm1107_vm12 = vcmp.ge.f32.partialorder %v1077_v31, 0.0 }
 0x325   : > { %v1141_v36 = vsel %vm1108_vm13, %v1082_v29, %v1125_v32 }
 0x326   : > { %v1140_v20 = vsel %vm1107_vm12, %v1077_v31, %v1124_v33 }
 0x327   : > { %1673 = vmatprep.mubr.f32.mxu1 %v1140_v20 }
 0x328   : > { %1674 = vmatmul.mubr.f32.gmra.mrb[20].mxu1 %v1141_v36 }
 0x332   : > { %v1622_v40 = vpop.f32.mrb[14].mxu1 }
 0x333   : > { %v1092_v42 = vadd.f32 %v1622_v40, %v2289_v14  ;;  %v1086_v43 = vpop.f32.mrb[15].mxu1 }
 0x334   : > { %v1087_v44 = vadd.f32 %v2289_v14, %v1086_v43 }
 0x335   : > { %v1127_v38 = vmul.f32 %v2291_v50, %v1092_v42  ;;  %vm1110_vm15 = vcmp.ge.f32.partialorder %v1092_v42, 0.0 }
 0x336   : > { %v1126_v1 = vmul.f32 %v2291_v50, %v1087_v44  ;;  %vm1109_vm14 = vcmp.ge.f32.partialorder %v1087_v44, 0.0 }
 0x337   : > { %v1143_v60 = vsel %vm1110_vm15, %v1092_v42, %v1127_v38 }
 0x338   : > { %v1142_v41 = vsel %vm1109_vm14, %v1087_v44, %v1126_v1 }
 0x339   : > { %1676 = vmatprep.mubr.f32.mxu1 %v1142_v41 }
 0x33a   : > { %1677 = vmatmul.mubr.f32.gmra.mrb[22].mxu1 %v1143_v60 }
 0x36b   : > { %v1657_v14 = vpop.f32.mrb[16].mxu0 }
 0x36c   : > { %v1238_v50 = vadd.f32 %v1657_v14, %v1412_v51  ;;  %v1232_v23 = vpop.f32.mrb[17].mxu0 }
 0x36d   : > { %v1233_v53 = vadd.f32 %v1412_v51, %v1232_v23 }
 0x36e   : > { %1313 = vst.msk [vmem:[%s2333_s11 + $0x8] sm:$0xff] %vm1311_vm0, %v1238_v50 }
 0x36f   : > { %1312 = vst.msk [vmem:[%s2333_s11] sm:$0xff] %vm1311_vm0, %v1233_v53 }
 0x398   : > { %v1660_v52 = vpop.f32.mrb[18].mxu0 }
 0x399   : > { %v1248_v54 = vadd.f32 %v1660_v52, %v1412_v51  ;;  %v1242_v0 = vpop.f32.mrb[19].mxu0 }
 0x39a   : > { %v1243_v56 = vadd.f32 %v1412_v51, %v1242_v0 }
 0x39b   : > { %1315 = vst.msk [vmem:[%s2333_s11 + $0x18] sm:$0xff] %vm1311_vm0, %v1248_v54 }
 0x39c   : > { %1314 = vst.msk [vmem:[%s2333_s11 + $0x10] sm:$0xff] %vm1311_vm0, %v1243_v56  ;;  %v1663_v59 = vpop.f32.mrb[20].mxu0 }
 0x39d   : > { %v1258_v61 = vadd.f32 %v1663_v59, %v1412_v51  ;;  %v1252_v63 = vpop.f32.mrb[21].mxu0 }
 0x39e   : > { %v1253_v35 = vadd.f32 %v1412_v51, %v1252_v63 }
 0x39f   : > { %1317 = vst.msk [vmem:[%s2333_s11 + $0x28] sm:$0xff] %vm1311_vm0, %v1258_v61 }
 0x3a0   : > { %1316 = vst.msk [vmem:[%s2333_s11 + $0x20] sm:$0xff] %vm1311_vm0, %v1253_v35 }
 0x3af   : > { %v1666_v2 = vpop.f32.mrb[22].mxu0 }
 0x3b0   : > { %v1268_v3 = vadd.f32 %v1666_v2, %v1412_v51  ;;  %v1262_v5 = vpop.f32.mrb[23].mxu0 }
 0x3b1   : > { %v1263_v6 = vadd.f32 %v1412_v51, %v1262_v5 }
 0x3b2   : > { %1319 = vst.msk [vmem:[%s2333_s11 + $0x38] sm:$0xff] %vm1311_vm0, %v1268_v3 }
 0x3b3   : > { %1318 = vst.msk [vmem:[%s2333_s11 + $0x30] sm:$0xff] %vm1311_vm0, %v1263_v6 }
 0x3cf   : > { %v1669_v7 = vpop.f32.mrb[16].mxu1 }
 0x3d0   : > { %v1278_v8 = vadd.f32 %v1669_v7, %v1412_v51  ;;  %v1272_v9 = vpop.f32.mrb[17].mxu1 }
 0x3d1   : > { %v1273_v10 = vadd.f32 %v1412_v51, %v1272_v9 }
 0x3d2   : > { %1321 = vst.msk [vmem:[%s2333_s11 + $0x48] sm:$0xff] %vm1311_vm0, %v1278_v8 }
 0x3d3   : > { %1320 = vst.msk [vmem:[%s2333_s11 + $0x40] sm:$0xff] %vm1311_vm0, %v1273_v10 }
 0x3e7   : > { %v1672_v34 = vpop.f32.mrb[18].mxu1 }
 0x3e8   : > { %v1288_v45 = vadd.f32 %v1672_v34, %v1412_v51  ;;  %v1282_v11 = vpop.f32.mrb[19].mxu1 }
 0x3e9   : > { %v1283_v12 = vadd.f32 %v1412_v51, %v1282_v11 }
 0x3ea   : > { %1323 = vst.msk [vmem:[%s2333_s11 + $0x58] sm:$0xff] %vm1311_vm0, %v1288_v45 }
 0x3eb   : > { %1322 = vst.msk [vmem:[%s2333_s11 + $0x50] sm:$0xff] %vm1311_vm0, %v1283_v12 }
 0x3fb   : > { %v1675_v46 = vpop.f32.mrb[20].mxu1 }
 0x3fc   : > { %v1298_v13 = vadd.f32 %v1675_v46, %v1412_v51  ;;  %v1292_v15 = vpop.f32.mrb[21].mxu1 }
 0x3fd   : > { %v1293_v16 = vadd.f32 %v1412_v51, %v1292_v15 }
 0x3fe   : > { %1325 = vst.msk [vmem:[%s2333_s11 + $0x68] sm:$0xff] %vm1311_vm0, %v1298_v13 }
 0x3ff   : > { %1324 = vst.msk [vmem:[%s2333_s11 + $0x60] sm:$0xff] %vm1311_vm0, %v1293_v16 }
 0x40d   : > { %v1678_v18 = vpop.f32.mrb[22].mxu1 }
 0x40e   : > { %v1308_v19 = vadd.f32 %v1678_v18, %v1412_v51  ;;  %v1302_v21 = vpop.f32.mrb[23].mxu1 }
 0x40f   : > { %v1303_v55 = vadd.f32 %v1412_v51, %v1302_v21 }
 0x410   : > { %1327 = vst.msk [vmem:[%s2333_s11 + $0x78] sm:$0xff] %vm1311_vm0, %v1308_v19 }
 0x411   : > { %1326 = vst.msk [vmem:[%s2333_s11 + $0x70] sm:$0xff] %vm1311_vm0, %v1303_v55 }
 0x412 PF: > { %s22_s23 = sadd.s32 1, %s1904_s23  }
 0x413   : > { %p19_p8 = scmp.ge.s32.totalorder %s22_s23, 4  }
 0x415   :  { %21 = sbr.rel (!%p19_p8) target bundleno = 16 (0x10), region = 73 }
 0x41c   :  { %1350 = vsyncpa [#allocation5], 1 }
 0x41d   :  { %1352 = vsyncpa [#allocation5 + $0x1], 1 }

</bundles_post_ra>
